<compile_context>
chip_gen: v7x
topology: tpu7x:2x2x1
jax: 0.10.0
libtpu: 0.0.40
codegen_flags: <defaults>
</compile_context>

<pallas_src>
import numpy as np
import jax
import jax.numpy as jnp
from jax.experimental import pallas as pl
from jax.experimental.pallas import tpu as pltpu

# ----------------------- synthetic hyper-parameters (small) -----------------------
B = 2                    # batch
NUM_STATS = 8            # graph nodes N (== num_stats)
NUM_NWP = 4
LOCAL_CNN_DIMS = 8       # D  (per-station conv output dim)
LOCAL_POINTS = 5         # conv kernel size == input length -> L_out = 1
NUM_TEMP = 6             # x2 (temporal) feature dim
EDGE_FEATURE_DIMS = 3
DECF_MLP_HIDDEN = 8      # H
WEIGHT_FUNCTION_DIM = 4  # W
GNN_DIM = 16             # G
READOUT_HID_DIM = 16     # R
MLP_HID_DIM1 = 16        # M1
Q_NUM = 5
NUM_EDGES = 10           # E

PARTITION_NODES = np.array([1, 1, 0, 1, 1, 0, 1, 1], dtype=bool)
PART_IDX = np.nonzero(PARTITION_NODES)[0]
P = int(PARTITION_NODES.sum())

F_CONV = NUM_NWP * LOCAL_POINTS          # per-station flattened conv receptive field
SF = NUM_STATS * F_CONV                  # 160
ND = NUM_STATS * LOCAL_CNN_DIMS          # 64
ED = NUM_EDGES * LOCAL_CNN_DIMS          # 80
EH = NUM_EDGES * DECF_MLP_HIDDEN         # 80
EW = NUM_EDGES * WEIGHT_FUNCTION_DIM     # 40
PG = P * GNN_DIM                         # 96


# ================================ fused forward kernel =============================
def ggc2lw_kernel(act_ref, bias_ref, wconv_ref, wx_ref, wt_ref, expg_ref,
                  k5w_ref, expk5_ref, lincgc_ref, wy_ref, w16_ref, o_ref):
    dot = lambda a, b: jnp.dot(a, b, preferred_element_type=jnp.float32)
    R, M1, W, Q = READOUT_HID_DIM, MLP_HID_DIM1, WEIGHT_FUNCTION_DIM, Q_NUM

    x1 = act_ref[:, :SF]                                               # (B, S*F)
    t = act_ref[:, SF:SF + NUM_TEMP]                                   # (B, T)

    # LocalConv1D: grouped conv (kernel == length) == block-diag matmul + ReLU
    x = jnp.maximum(dot(x1, wconv_ref[...]) + bias_ref[0:1, :ND], 0.0)          # (B, N*D)

    # stacked dots sharing x / t as LHS (rx + k3/k4-folded ker term; k2/r1/l1 terms)
    xcat = dot(x, wx_ref[...])         # [:, :ED]=rinc@x, [:, 128:128+EH]=x@kx
    tcat = dot(t, wt_ref[...])         # [:, :EH]=k2(t),  [:, 128:...]=readout1/mlp-l1
    rx = xcat[:, :ED]                                                  # (B, E*D)

    # ----- WDSGCN2 edge kernel -----
    ker = bias_ref[1:2, :EH] + tcat[:, :EH] + xcat[:, 128:128 + EH]              # (B, E*H)
    ker = jnp.where(ker > 0, ker, 0.02 * ker)                          # LeakyReLU(0.02)
    k5 = jnp.maximum(dot(ker, k5w_ref[...]) + bias_ref[2:3, :EW], 0.0)           # (B, E*W)

    # wk[b, (w,e,d)] = k5[b,e,w] * rx[b,e,d]; the rx side is a lane tile, not a matmul
    wk = dot(k5, expk5_ref[...]) * jnp.concatenate([rx] * W, axis=1)             # (B, W*E*D)
    # (linc @ wk) @ gc fused into one dot
    y = jnp.maximum(dot(wk, lincgc_ref[...]) + bias_ref[3:4, :PG], 0.0)          # (B, P*G)

    # ----- readout (r1b + cap@r2 pre-folded into bias row 4) -----
    r = dot(y, wy_ref[:, :R]) + tcat[:, 128:128 + R] + bias_ref[4:5, :R]         # (B, R)
    r = jnp.where(r > 0, r, 0.01 * r)                                  # LeakyReLU(default)
    wgt = jnp.maximum(dot(r, w16_ref[:, :P]) + bias_ref[5:6, :P], 0.0)           # (B, P)

    # ggc = sum_p wgt[p]*y[p,:]; the sum over p is folded into the l1 weight
    gy = dot(wgt, expg_ref[...]) * y                                   # (B, P*G)
    h = (dot(gy, wy_ref[:, R:R + M1])
         + tcat[:, 128 + R:128 + R + M1] + bias_ref[6:7, :M1])         # (B, M1)
    h = jnp.where(h > 0, h, jnp.exp(jnp.minimum(h, 0.0)) - 1.0)        # ELU(alpha=1)
    o_ref[...] = dot(h, w16_ref[:, 128:128 + Q]) + bias_ref[7:8, :Q]   # (B, Q)


PRE_ORDER = ('bias', 'wconv', 'wx', 'wt', 'expg', 'k5w', 'expk5', 'lincgc', 'wy', 'w16')


def precompute(prm, graph):
    """Build all static / weight-derived matrices ONCE (outside jit)."""
    S, D, F = NUM_STATS, LOCAL_CNN_DIMS, F_CONV
    E, N, H, W = NUM_EDGES, NUM_STATS, DECF_MLP_HIDDEN, WEIGHT_FUNCTION_DIM
    G, R, T = GNN_DIM, READOUT_HID_DIM, NUM_TEMP
    M1, Q = MLP_HID_DIM1, Q_NUM
    f32 = jnp.float32
    eye = lambda n: jnp.eye(n, dtype=f32)
    ones = lambda s: jnp.ones(s, f32)

    # grouped conv -> block-diagonal weight (S*F, S*D); columns ordered (s, d)
    wg = prm['conv_w'].reshape(S, D, F).transpose(0, 2, 1)             # (S, F, D)
    wconv = jnp.einsum('sfd,st->sftd', wg, eye(S)).reshape(S * F, S * D)

    linc, rinc = graph['linc'], graph['rinc']                          # (P,E), (E,N)
    rinc_big = jnp.kron(rinc.T, eye(D))                                # (N*D, E*D)
    # fold the partition-node gather into linc^T (zero columns for excluded nodes)
    linct_full = jnp.zeros((E, N), f32).at[:, PART_IDX].set(linc.T)
    linct_big = jnp.kron(linct_full.T, eye(D))                         # (N*D, E*D)

    # fold k3 / k4 onto x:  ker_x = x @ kx
    kx = (linct_big @ jnp.kron(eye(E), prm['k3w'].T)
          + rinc_big @ jnp.kron(eye(E), prm['k4w'].T))                 # (N*D, E*H)
    # stacked x-RHS: [rinc_big | 0-pad | kx]; kx segment starts at lane 128
    wx = (jnp.zeros((N * D, 128 + E * H), f32)
          .at[:, :E * D].set(rinc_big)
          .at[:, 128:128 + E * H].set(kx))

    # stacked t-RHS: [k2 | 0-pad | readout1 | mlp-l1]
    wt = (jnp.zeros((T, 128 + R + M1), f32)
          .at[:, :E * H].set(jnp.tile(prm['k2w'].T, (1, E)))
          .at[:, 128:128 + R].set(prm['r1w'].T)
          .at[:, 128 + R:128 + R + M1].set(prm['l1w'][:, G:].T))

    # per-edge k5 linear: block-diagonal
    k5w = jnp.kron(eye(E), prm['k5w'].T)                               # (E*H, E*W)

    # k5 lanes (e,w) -> wk lanes (w,e,d): commutation matrix ⊗ ones(1,D)
    comm = jnp.einsum('ei,wj->ewji', eye(E), eye(W)).reshape(E * W, W * E)
    expk5 = jnp.kron(comm, ones((1, D)))                               # (E*W, W*E*D)

    # fused (linc @ .) @ gc, with wk rows ordered (w, e, d)
    gcT = prm['gc_w'].T.reshape(W, D, G)                               # gc_w.T rows are (w,d)
    lincgc = jnp.einsum('pe,wdg->wedpg', linc, gcT).reshape(W * E * D, P * G)

    # fold the partition sum (sumg) into the MLP l1 weight
    sumg = jnp.kron(ones((P, 1)), eye(G))                              # (P*G, G)
    sumg_l1 = sumg @ prm['l1w'][:, :G].T                               # (P*G, M1)
    wy = jnp.concatenate([prm['r0w'].T, sumg_l1], axis=1)              # (P*G, R+M1)

    # r3^T and l3^T share one buffer (relies on R == MLP_HID_DIM1, true here)
    w16 = (jnp.zeros((R, 128 + Q), f32)
           .at[:, :P].set(prm['r3w'].T)
           .at[:, 128:128 + Q].set(prm['l3w'].T))

    expg = jnp.kron(eye(P), ones((1, G)))                              # (P, P*G)

    # all (1, n) bias rows packed into one (8, 128) table; r1b + cap@r2 folded
    k1_lanes = (graph['ef'][:, :-1] @ prm['k1w'].T + prm['k1b']).reshape(E * H)
    bias = (jnp.zeros((8, 128), f32)
            .at[0, :S * D].set(prm['conv_b'])
            .at[1, :E * H].set(k1_lanes)
            .at[2, :E * W].set(jnp.tile(prm['k5b'], E))
            .at[3, :P * G].set(jnp.tile(prm['gc_b'], P))
            .at[4, :R].set(prm['r1b'] + graph['cap'] @ prm['r2w'].T)
            .at[5, :P].set(prm['r3b'])
            .at[6, :M1].set(prm['l1b'])
            .at[7, :Q].set(prm['l3b']))

    return {'bias': bias, 'wconv': wconv, 'wx': wx, 'wt': wt, 'expg': expg,
            'k5w': k5w, 'expk5': expk5, 'lincgc': lincgc, 'wy': wy, 'w16': w16}


def ggc2lw_forward(x1, x2, pre):
    # single activation input: flattened per-station receptive fields + temporal feats
    act = jnp.concatenate([x1.reshape(B, SF), x2], axis=1)             # (B, S*F + T)
    inputs = (act,) + tuple(pre[k] for k in PRE_ORDER)
    return pl.pallas_call(
        ggc2lw_kernel,
        out_shape=jax.ShapeDtypeStruct((B, Q_NUM), jnp.float32),
        in_specs=[pl.BlockSpec(memory_space=pltpu.MemorySpace.VMEM)] * len(inputs),
        out_specs=pl.BlockSpec(memory_space=pltpu.MemorySpace.VMEM),
    )(*inputs)


# ================================== param / data init ==============================
def make_params(key):
    ks = iter(jax.random.split(key, 40))
    u = lambda shape, lim: jax.random.uniform(next(ks), shape, jnp.float32, -lim, lim)
    S, D, H, W, G, R, T = (NUM_STATS, LOCAL_CNN_DIMS, DECF_MLP_HIDDEN,
                           WEIGHT_FUNCTION_DIM, GNN_DIM, READOUT_HID_DIM, NUM_TEMP)
    lc = 1.0 / np.sqrt(F_CONV)
    return {
        'conv_w': u((S * D, NUM_NWP, LOCAL_POINTS), lc), 'conv_b': u((S * D,), lc),
        'k1w': u((H, EDGE_FEATURE_DIMS), 1 / np.sqrt(EDGE_FEATURE_DIMS)),
        'k1b': u((H,), 1 / np.sqrt(EDGE_FEATURE_DIMS)),
        'k2w': u((H, T), 1 / np.sqrt(T)),
        'k3w': u((H, D), 1 / np.sqrt(D)),
        'k4w': u((H, D), 1 / np.sqrt(D)),
        'k5w': u((W, H), 1 / np.sqrt(H)), 'k5b': u((W,), 1 / np.sqrt(H)),
        'gc_w': u((G, D * W), 1 / np.sqrt(D * W)), 'gc_b': u((G,), 1 / np.sqrt(D * W)),
        'r0w': u((R, G * P), 1 / np.sqrt(G * P)),
        'r1w': u((R, T), 1 / np.sqrt(T)), 'r1b': u((R,), 1 / np.sqrt(T)),
        'r2w': u((R, P), 1 / np.sqrt(P)),
        'r3w': u((P, R), 1 / np.sqrt(R)), 'r3b': u((P,), 1 / np.sqrt(R)),
        'l1w': u((MLP_HID_DIM1, G + T), 1 / np.sqrt(G + T)),
        'l1b': u((MLP_HID_DIM1,), 1 / np.sqrt(G + T)),
        'l3w': u((Q_NUM, MLP_HID_DIM1), 1 / np.sqrt(MLP_HID_DIM1)),
        'l3b': u((Q_NUM,), 1 / np.sqrt(MLP_HID_DIM1)),
    }


def make_graph(key):
    ks = iter(jax.random.split(key, 4))
    return {
        'linc': jax.random.uniform(next(ks), (P, NUM_EDGES), jnp.float32, -1.0, 1.0),
        'rinc': jax.random.uniform(next(ks), (NUM_EDGES, NUM_STATS), jnp.float32, -1.0, 1.0),
        'ef':   jax.random.uniform(next(ks), (NUM_EDGES, EDGE_FEATURE_DIMS + 1), jnp.float32, 0.0, 1.0),
        'cap':  jax.random.uniform(next(ks), (P,), jnp.float32, 0.0, 1.0),
    }


# ================================= pure-JAX reference ==============================
def reference_forward(x1, x2, prm, graph):
    S, D, F = NUM_STATS, LOCAL_CNN_DIMS, F_CONV
    xg = x1.reshape(B, S, F)
    wg = prm['conv_w'].reshape(S, D, F)
    x = jax.nn.relu(jnp.einsum('bsf,sdf->bsd', xg, wg) + prm['conv_b'].reshape(S, D)[None])
    t = x2
    xp = x[:, PART_IDX, :]
    linc, rinc, ef, cap = graph['linc'], graph['rinc'], graph['ef'][:, :-1], graph['cap']
    k1 = ef @ prm['k1w'].T + prm['k1b']
    k2 = t @ prm['k2w'].T
    lx = jnp.einsum('pe,bpd->bed', linc, xp)
    rx = jnp.einsum('en,bnd->bed', rinc, x)
    ker = k1[None] + k2[:, None, :] + lx @ prm['k3w'].T + rx @ prm['k4w'].T
    ker = jnp.where(ker > 0, ker, 0.02 * ker)
    ker = jax.nn.relu(ker @ prm['k5w'].T + prm['k5b'])
    wk = (ker[:, :, :, None] * rx[:, :, None, :]).reshape(B, NUM_EDGES, -1)
    z = jnp.einsum('pe,bef->bpf', linc, wk)
    y = jax.nn.relu(z @ prm['gc_w'].T + prm['gc_b'])
    r = y.reshape(B, -1) @ prm['r0w'].T + t @ prm['r1w'].T + prm['r1b'] + cap @ prm['r2w'].T
    r = jnp.where(r > 0, r, 0.01 * r)
    wgt = jax.nn.relu(r @ prm['r3w'].T + prm['r3b'])
    ggc = jnp.einsum('bp,bpg->bg', wgt, y)
    zc = jnp.concatenate([ggc, t], axis=1)
    h = zc @ prm['l1w'].T + prm['l1b']
    h = jnp.where(h > 0, h, jnp.exp(jnp.minimum(h, 0.0)) - 1.0)
    return h @ prm['l3w'].T + prm['l3b']


# ======================================= main ======================================
if __name__ == "__main__":
    key = jax.random.PRNGKey(0)
    kp, kg, kx1, kx2 = jax.random.split(key, 4)
    prm = make_params(kp)
    graph = make_graph(kg)
    x1 = jax.random.normal(kx1, (B, NUM_STATS * NUM_NWP, LOCAL_POINTS), jnp.float32)
    x2 = jax.random.normal(kx2, (B, NUM_TEMP), jnp.float32)

    pre = precompute(prm, graph)             # static / weight-derived matrices, built once
    fwd = jax.jit(ggc2lw_forward)
    out = jax.block_until_ready(fwd(x1, x2, pre))

    ref = reference_forward(x1, x2, prm, graph)
    np.testing.assert_allclose(np.asarray(out), np.asarray(ref), rtol=2e-2, atol=2e-2)
    assert out.shape == (B, Q_NUM)
    print("KERNEL_OK")
</pallas_src>

<mosaic_0001>
module attributes {stable_mosaic.version = 11 : i64} {
  func.func @ggc2lw_kernel(%arg0: memref<2x166xf32, #tpu.memory_space<vmem>>, %arg1: memref<8x128xf32, #tpu.memory_space<vmem>>, %arg2: memref<160x64xf32, #tpu.memory_space<vmem>>, %arg3: memref<64x208xf32, #tpu.memory_space<vmem>>, %arg4: memref<6x160xf32, #tpu.memory_space<vmem>>, %arg5: memref<6x96xf32, #tpu.memory_space<vmem>>, %arg6: memref<80x40xf32, #tpu.memory_space<vmem>>, %arg7: memref<40x320xf32, #tpu.memory_space<vmem>>, %arg8: memref<320x96xf32, #tpu.memory_space<vmem>>, %arg9: memref<96x32xf32, #tpu.memory_space<vmem>>, %arg10: memref<16x133xf32, #tpu.memory_space<vmem>>, %arg11: memref<2x5xf32, #tpu.memory_space<vmem>>) attributes {dimension_semantics = [], scalar_prefetch = 0 : i64, scratch_operands = 0 : i64, tpu.core_type = #tpu.core_type<tc>} {
    %c0 = arith.constant 0 : index
    %c0_0 = arith.constant 0 : index
    %0 = vector.load %arg0[%c0, %c0_0] : memref<2x166xf32, #tpu.memory_space<vmem>>, vector<2x160xf32>
    %c0_1 = arith.constant 0 : index
    %c160 = arith.constant 160 : index
    %1 = vector.load %arg0[%c0_1, %c160] : memref<2x166xf32, #tpu.memory_space<vmem>>, vector<2x6xf32>
    %c0_2 = arith.constant 0 : index
    %c0_3 = arith.constant 0 : index
    %2 = vector.load %arg2[%c0_2, %c0_3] : memref<160x64xf32, #tpu.memory_space<vmem>>, vector<160x64xf32>
    %cst = arith.constant dense<0.000000e+00> : vector<2x64xf32>
    %3 = tpu.matmul %0, %2, %cst {dimension_numbers = #tpu.dot_dimension_numbers<[1], [0], [0], [1], [0, 0, 1, 1], [], []>} : vector<2x160xf32>, vector<160x64xf32>, vector<2x64xf32> -> vector<2x64xf32>
    %c0_4 = arith.constant 0 : index
    %c0_5 = arith.constant 0 : index
    %4 = vector.load %arg1[%c0_4, %c0_5] : memref<8x128xf32, #tpu.memory_space<vmem>>, vector<1x64xf32>
    %5 = vector.broadcast %4 : vector<1x64xf32> to vector<2x64xf32>
    %6 = arith.addf %3, %5 : vector<2x64xf32>
    %cst_6 = arith.constant 0.000000e+00 : f32
    %7 = vector.broadcast %cst_6 : f32 to vector<2x64xf32>
    %8 = arith.maximumf %6, %7 : vector<2x64xf32>
    %c0_7 = arith.constant 0 : index
    %c0_8 = arith.constant 0 : index
    %9 = vector.load %arg3[%c0_7, %c0_8] : memref<64x208xf32, #tpu.memory_space<vmem>>, vector<64x208xf32>
    %cst_9 = arith.constant dense<0.000000e+00> : vector<2x208xf32>
    %10 = tpu.matmul %8, %9, %cst_9 {dimension_numbers = #tpu.dot_dimension_numbers<[1], [0], [0], [1], [0, 0, 1, 1], [], []>} : vector<2x64xf32>, vector<64x208xf32>, vector<2x208xf32> -> vector<2x208xf32>
    %c0_10 = arith.constant 0 : index
    %c0_11 = arith.constant 0 : index
    %11 = vector.load %arg4[%c0_10, %c0_11] : memref<6x160xf32, #tpu.memory_space<vmem>>, vector<6x160xf32>
    %cst_12 = arith.constant dense<0.000000e+00> : vector<2x160xf32>
    %12 = tpu.matmul %1, %11, %cst_12 {dimension_numbers = #tpu.dot_dimension_numbers<[1], [0], [0], [1], [0, 0, 1, 1], [], []>} : vector<2x6xf32>, vector<6x160xf32>, vector<2x160xf32> -> vector<2x160xf32>
    %13 = vector.extract_strided_slice %10 {offsets = [0, 0], sizes = [2, 80], strides = [1, 1]} : vector<2x208xf32> to vector<2x80xf32>
    %c1 = arith.constant 1 : index
    %c0_13 = arith.constant 0 : index
    %14 = vector.load %arg1[%c1, %c0_13] : memref<8x128xf32, #tpu.memory_space<vmem>>, vector<1x80xf32>
    %15 = vector.extract_strided_slice %12 {offsets = [0, 0], sizes = [2, 80], strides = [1, 1]} : vector<2x160xf32> to vector<2x80xf32>
    %16 = vector.broadcast %14 : vector<1x80xf32> to vector<2x80xf32>
    %17 = arith.addf %16, %15 : vector<2x80xf32>
    %18 = vector.extract_strided_slice %10 {offsets = [0, 128], sizes = [2, 80], strides = [1, 1]} : vector<2x208xf32> to vector<2x80xf32>
    %19 = arith.addf %17, %18 : vector<2x80xf32>
    %cst_14 = arith.constant 0.000000e+00 : f32
    %20 = vector.broadcast %cst_14 : f32 to vector<2x80xf32>
    %21 = arith.cmpf ogt, %19, %20 : vector<2x80xf32>
    %cst_15 = arith.constant 2.000000e-02 : f32
    %22 = vector.broadcast %cst_15 : f32 to vector<2x80xf32>
    %23 = arith.mulf %22, %19 : vector<2x80xf32>
    %24 = arith.select %21, %19, %23 : vector<2x80xi1>, vector<2x80xf32>
    %c0_16 = arith.constant 0 : index
    %c0_17 = arith.constant 0 : index
    %25 = vector.load %arg6[%c0_16, %c0_17] : memref<80x40xf32, #tpu.memory_space<vmem>>, vector<80x40xf32>
    %cst_18 = arith.constant dense<0.000000e+00> : vector<2x40xf32>
    %26 = tpu.matmul %24, %25, %cst_18 {dimension_numbers = #tpu.dot_dimension_numbers<[1], [0], [0], [1], [0, 0, 1, 1], [], []>} : vector<2x80xf32>, vector<80x40xf32>, vector<2x40xf32> -> vector<2x40xf32>
    %c2 = arith.constant 2 : index
    %c0_19 = arith.constant 0 : index
    %27 = vector.load %arg1[%c2, %c0_19] : memref<8x128xf32, #tpu.memory_space<vmem>>, vector<1x40xf32>
    %28 = vector.broadcast %27 : vector<1x40xf32> to vector<2x40xf32>
    %29 = arith.addf %26, %28 : vector<2x40xf32>
    %cst_20 = arith.constant 0.000000e+00 : f32
    %30 = vector.broadcast %cst_20 : f32 to vector<2x40xf32>
    %31 = arith.maximumf %29, %30 : vector<2x40xf32>
    %c0_21 = arith.constant 0 : index
    %c0_22 = arith.constant 0 : index
    %32 = vector.load %arg7[%c0_21, %c0_22] : memref<40x320xf32, #tpu.memory_space<vmem>>, vector<40x320xf32>
    %cst_23 = arith.constant dense<0.000000e+00> : vector<2x320xf32>
    %33 = tpu.matmul %31, %32, %cst_23 {dimension_numbers = #tpu.dot_dimension_numbers<[1], [0], [0], [1], [0, 0, 1, 1], [], []>} : vector<2x40xf32>, vector<40x320xf32>, vector<2x320xf32> -> vector<2x320xf32>
    %34 = tpu.concatenate %13, %13, %13, %13 in 1 : vector<2x80xf32>, vector<2x80xf32>, vector<2x80xf32>, vector<2x80xf32> -> vector<2x320xf32>
    %35 = arith.mulf %33, %34 : vector<2x320xf32>
    %c0_24 = arith.constant 0 : index
    %c0_25 = arith.constant 0 : index
    %36 = vector.load %arg8[%c0_24, %c0_25] : memref<320x96xf32, #tpu.memory_space<vmem>>, vector<320x96xf32>
    %cst_26 = arith.constant dense<0.000000e+00> : vector<2x96xf32>
    %37 = tpu.matmul %35, %36, %cst_26 {dimension_numbers = #tpu.dot_dimension_numbers<[1], [0], [0], [1], [0, 0, 1, 1], [], []>} : vector<2x320xf32>, vector<320x96xf32>, vector<2x96xf32> -> vector<2x96xf32>
    %c3 = arith.constant 3 : index
    %c0_27 = arith.constant 0 : index
    %38 = vector.load %arg1[%c3, %c0_27] : memref<8x128xf32, #tpu.memory_space<vmem>>, vector<1x96xf32>
    %39 = vector.broadcast %38 : vector<1x96xf32> to vector<2x96xf32>
    %40 = arith.addf %37, %39 : vector<2x96xf32>
    %cst_28 = arith.constant 0.000000e+00 : f32
    %41 = vector.broadcast %cst_28 : f32 to vector<2x96xf32>
    %42 = arith.maximumf %40, %41 : vector<2x96xf32>
    %c0_29 = arith.constant 0 : index
    %c0_30 = arith.constant 0 : index
    %43 = vector.load %arg9[%c0_29, %c0_30] : memref<96x32xf32, #tpu.memory_space<vmem>>, vector<96x16xf32>
    %cst_31 = arith.constant dense<0.000000e+00> : vector<2x16xf32>
    %44 = tpu.matmul %42, %43, %cst_31 {dimension_numbers = #tpu.dot_dimension_numbers<[1], [0], [0], [1], [0, 0, 1, 1], [], []>} : vector<2x96xf32>, vector<96x16xf32>, vector<2x16xf32> -> vector<2x16xf32>
    %45 = vector.extract_strided_slice %12 {offsets = [0, 128], sizes = [2, 16], strides = [1, 1]} : vector<2x160xf32> to vector<2x16xf32>
    %46 = arith.addf %44, %45 : vector<2x16xf32>
    %c4 = arith.constant 4 : index
    %c0_32 = arith.constant 0 : index
    %47 = vector.load %arg1[%c4, %c0_32] : memref<8x128xf32, #tpu.memory_space<vmem>>, vector<1x16xf32>
    %48 = vector.broadcast %47 : vector<1x16xf32> to vector<2x16xf32>
    %49 = arith.addf %46, %48 : vector<2x16xf32>
    %cst_33 = arith.constant 0.000000e+00 : f32
    %50 = vector.broadcast %cst_33 : f32 to vector<2x16xf32>
    %51 = arith.cmpf ogt, %49, %50 : vector<2x16xf32>
    %cst_34 = arith.constant 0.00999999977 : f32
    %52 = vector.broadcast %cst_34 : f32 to vector<2x16xf32>
    %53 = arith.mulf %52, %49 : vector<2x16xf32>
    %54 = arith.select %51, %49, %53 : vector<2x16xi1>, vector<2x16xf32>
    %c0_35 = arith.constant 0 : index
    %c0_36 = arith.constant 0 : index
    %55 = vector.load %arg10[%c0_35, %c0_36] : memref<16x133xf32, #tpu.memory_space<vmem>>, vector<16x6xf32>
    %cst_37 = arith.constant dense<0.000000e+00> : vector<2x6xf32>
    %56 = tpu.matmul %54, %55, %cst_37 {dimension_numbers = #tpu.dot_dimension_numbers<[1], [0], [0], [1], [0, 0, 1, 1], [], []>} : vector<2x16xf32>, vector<16x6xf32>, vector<2x6xf32> -> vector<2x6xf32>
    %c5 = arith.constant 5 : index
    %c0_38 = arith.constant 0 : index
    %57 = vector.load %arg1[%c5, %c0_38] : memref<8x128xf32, #tpu.memory_space<vmem>>, vector<1x6xf32>
    %58 = vector.broadcast %57 : vector<1x6xf32> to vector<2x6xf32>
    %59 = arith.addf %56, %58 : vector<2x6xf32>
    %cst_39 = arith.constant 0.000000e+00 : f32
    %60 = vector.broadcast %cst_39 : f32 to vector<2x6xf32>
    %61 = arith.maximumf %59, %60 : vector<2x6xf32>
    %c0_40 = arith.constant 0 : index
    %c0_41 = arith.constant 0 : index
    %62 = vector.load %arg5[%c0_40, %c0_41] : memref<6x96xf32, #tpu.memory_space<vmem>>, vector<6x96xf32>
    %cst_42 = arith.constant dense<0.000000e+00> : vector<2x96xf32>
    %63 = tpu.matmul %61, %62, %cst_42 {dimension_numbers = #tpu.dot_dimension_numbers<[1], [0], [0], [1], [0, 0, 1, 1], [], []>} : vector<2x6xf32>, vector<6x96xf32>, vector<2x96xf32> -> vector<2x96xf32>
    %64 = arith.mulf %63, %42 : vector<2x96xf32>
    %c0_43 = arith.constant 0 : index
    %c16 = arith.constant 16 : index
    %65 = vector.load %arg9[%c0_43, %c16] : memref<96x32xf32, #tpu.memory_space<vmem>>, vector<96x16xf32>
    %cst_44 = arith.constant dense<0.000000e+00> : vector<2x16xf32>
    %66 = tpu.matmul %64, %65, %cst_44 {dimension_numbers = #tpu.dot_dimension_numbers<[1], [0], [0], [1], [0, 0, 1, 1], [], []>} : vector<2x96xf32>, vector<96x16xf32>, vector<2x16xf32> -> vector<2x16xf32>
    %67 = vector.extract_strided_slice %12 {offsets = [0, 144], sizes = [2, 16], strides = [1, 1]} : vector<2x160xf32> to vector<2x16xf32>
    %68 = arith.addf %66, %67 : vector<2x16xf32>
    %c6 = arith.constant 6 : index
    %c0_45 = arith.constant 0 : index
    %69 = vector.load %arg1[%c6, %c0_45] : memref<8x128xf32, #tpu.memory_space<vmem>>, vector<1x16xf32>
    %70 = vector.broadcast %69 : vector<1x16xf32> to vector<2x16xf32>
    %71 = arith.addf %68, %70 : vector<2x16xf32>
    %cst_46 = arith.constant 0.000000e+00 : f32
    %72 = vector.broadcast %cst_46 : f32 to vector<2x16xf32>
    %73 = arith.cmpf ogt, %71, %72 : vector<2x16xf32>
    %cst_47 = arith.constant 0.000000e+00 : f32
    %74 = vector.broadcast %cst_47 : f32 to vector<2x16xf32>
    %75 = arith.minimumf %71, %74 : vector<2x16xf32>
    %76 = math.exp %75 : vector<2x16xf32>
    %cst_48 = arith.constant 1.000000e+00 : f32
    %77 = vector.broadcast %cst_48 : f32 to vector<2x16xf32>
    %78 = arith.subf %76, %77 : vector<2x16xf32>
    %79 = arith.select %73, %71, %78 : vector<2x16xi1>, vector<2x16xf32>
    %c0_49 = arith.constant 0 : index
    %c128 = arith.constant 128 : index
    %80 = vector.load %arg10[%c0_49, %c128] : memref<16x133xf32, #tpu.memory_space<vmem>>, vector<16x5xf32>
    %cst_50 = arith.constant dense<0.000000e+00> : vector<2x5xf32>
    %81 = tpu.matmul %79, %80, %cst_50 {dimension_numbers = #tpu.dot_dimension_numbers<[1], [0], [0], [1], [0, 0, 1, 1], [], []>} : vector<2x16xf32>, vector<16x5xf32>, vector<2x5xf32> -> vector<2x5xf32>
    %c7 = arith.constant 7 : index
    %c0_51 = arith.constant 0 : index
    %82 = vector.load %arg1[%c7, %c0_51] : memref<8x128xf32, #tpu.memory_space<vmem>>, vector<1x5xf32>
    %83 = vector.broadcast %82 : vector<1x5xf32> to vector<2x5xf32>
    %84 = arith.addf %81, %83 : vector<2x5xf32>
    %c0_52 = arith.constant 0 : index
    %c0_53 = arith.constant 0 : index
    %85 = vector.load %arg11[%c0_52, %c0_53] : memref<2x5xf32, #tpu.memory_space<vmem>>, vector<2x5xf32>
    tpu.vector_store %arg11[%c0_52, %c0_53], %84 {strides = array<i32>} : memref<2x5xf32, #tpu.memory_space<vmem>>, vector<2x5xf32>,
    return
  }
}

</mosaic_0001>

<bundles_post_ra>
// kernel: ggc2lw_forward.1
= control target key start
LH: loop header
LB: loop body
LE: loop exit
PB: predicated region body
PF: predicated region fallthrough
CT: control target
= control target key end

     0   :  { %v1762_v3 = vmov 0.0|0.0   ;;  %vm76_vm0 = vcmask 261120   ;;  %s1763_s22 = smov 96   ;;  %s2368_s0 = inlined_call_operand.vmem [shape: f32[2,166], index: 0, kind: input, shape index: {}]   ;;  %s2369_s1 = inlined_call_operand.vmem [shape: f32[8,128], index: 1, kind: input, shape index: {}]   ;;  %s2370_s2 = inlined_call_operand.vmem [shape: f32[160,64], index: 2, kind: input, shape index: {}]   ;;  %s2371_s3 = inlined_call_operand.vmem [shape: f32[64,208], index: 3, kind: input, shape index: {}]   ;;  %s2372_s4 = inlined_call_operand.vmem [shape: f32[6,160], index: 4, kind: input, shape index: {}]   ;;  %s2373_s5 = inlined_call_operand.vmem [shape: f32[6,96], index: 5, kind: input, shape index: {}]   ;;  %s2374_s6 = inlined_call_operand.vmem [shape: f32[80,40], index: 6, kind: input, shape index: {}]   ;;  %s2375_s7 = inlined_call_operand.vmem [shape: f32[40,320], index: 7, kind: input, shape index: {}]   ;;  %s2376_s8 = inlined_call_operand.vmem [shape: f32[320,96], index: 8, kind: input, shape index: {}]   ;;  %s2377_s9 = inlined_call_operand.vmem [shape: f32[96,32], index: 9, kind: input, shape index: {}]   ;;  %s2378_s10 = inlined_call_operand.vmem [shape: f32[16,133], index: 10, kind: input, shape index: {}]   ;;  %s2379_s11 = inlined_call_operand.hbm [shape: f32[2,5], index: 11, kind: output, shape index: {}]  }
   0x1   :  { %v41_v0 = vld [vmem:[%s2370_s2] sm:$0xff]  ;;  %v42_v1 = vld [vmem:[%s2370_s2 + $0x8] sm:$0xff]  ;;  %v43_v2 = vld [vmem:[%s2370_s2 + $0x10] sm:$0xff]  ;;  %1537 = vmatprep.subr.bf16.mxu0 %v1762_v3 }
   0x2   :  { %v1538_v4 = vpack.c.bf16 %v42_v1, %v41_v0  ;;  %v44_v5 = vld [vmem:[%s2370_s2 + $0x18] sm:$0xff]  ;;  %v45_v7 = vld [vmem:[%s2370_s2 + $0x20] sm:$0xff]  ;;  %v46_v8 = vld [vmem:[%s2370_s2 + $0x28] sm:$0xff] }
   0x3   :  { %v1541_v6 = vpack.c.bf16 %v44_v5, %v43_v2  ;;  %v47_v9 = vld [vmem:[%s2370_s2 + $0x30] sm:$0xff]  ;;  %v48_v10 = vld [vmem:[%s2370_s2 + $0x38] sm:$0xff]  ;;  %v1859_v11 = vld.sshfl [vmem:[%s2368_s0] sm:$0x33 pattern:$0x76325410]  ;;  %v1544_v12 = vpack.c.bf16 %v46_v8, %v45_v7 }
   0x4   :  { %1539 = vmatpush1.bf16.msra.mxu0 %v1538_v4  ;;  %v74_v13 = vcombine.high %v1859_v11, %v1859_v11  ;;  %v1292_v14 = vld.sshfl [vmem:[%s2368_s0 + $0x2] sm:$0x3 pattern:$0x76325410]  ;;  %v151_v15 = vld [vmem:[%s2371_s3 + $0x8] sm:$0xff]  ;;  %v153_v16 = vld [vmem:[%s2371_s3 + $0x18] sm:$0xff]  ;;  %v1547_v28 = vpack.c.bf16 %v48_v10, %v47_v9 }
   0x5   :  { %1540 = vmatprep.subr.bf16.mxu0 %v1762_v3  ;;  %251 = vrot.lane.b32.xlu0 %v1292_v14, %s1763_s22  ;;  %v1567_v17 = vpack.c.bf16 %v153_v16, %v151_v15  ;;  %v150_v18 = vld [vmem:[%s2371_s3] sm:$0xff]  ;;  %v152_v19 = vld [vmem:[%s2371_s3 + $0x10] sm:$0xff]  ;;  %v155_v20 = vld [vmem:[%s2371_s3 + $0x28] sm:$0xff] }
   0x6   :  { %1290 = vmatprep.mubr.msk.f32.mxu0 %vm76_vm0, %v74_v13  ;;  %v1569_v21 = vpack.c.bf16 %v152_v19, %v150_v18  ;;  %v157_v22 = vld [vmem:[%s2371_s3 + $0x38] sm:$0xff]  ;;  %v154_v23 = vld [vmem:[%s2371_s3 + $0x20] sm:$0xff]  ;;  %v156_v24 = vld [vmem:[%s2371_s3 + $0x30] sm:$0xff] }
   0x7   :  { %1568 = vmatprep.subr.bf16.mxu1 %v1567_v17  ;;  %v1571_v25 = vpack.c.bf16 %v157_v22, %v155_v20  ;;  %v159_v26 = vld [vmem:[%s2371_s3 + $0x48] sm:$0xff]  ;;  %v161_v27 = vld [vmem:[%s2371_s3 + $0x58] sm:$0xff]  ;;  %v49_v29 = vld [vmem:[%s2370_s2 + $0x40] sm:$0xff]  ;;  %v1573_v30 = vpack.c.bf16 %v156_v24, %v154_v23 }
   0x8   :  { %1542 = vmatpush1.bf16.msra.mxu0 %v1541_v6  ;;  %1570 = vmatpush1.bf16.msra.mxu1 %v1569_v21 }
   0x9   :  { %1543 = vmatprep.subr.bf16.mxu0 %v1762_v3 }
   0xc   :  { %1545 = vmatpush1.bf16.msra.mxu0 %v1544_v12 }
   0xd   :  { %16 = vsyncpa [#allocation3], 0  ;;  %1546 = vmatprep.subr.bf16.mxu0 %v1762_v3  ;;  %v50_v31 = vld [vmem:[%s2370_s2 + $0x48] sm:$0xff]  ;;  %1572 = vmatprep.subr.bf16.mxu1 %v1571_v25  ;;  %v1575_v32 = vpack.c.bf16 %v161_v27, %v159_v26  ;;  %v158_v33 = vld [vmem:[%s2371_s3 + $0x40] sm:$0xff]  ;;  %vm256_vm1 = vcmask 1045504   ;;  %v1764_v59 = vmov 0.0  }
   0xe   :  { %v160_v34 = vld [vmem:[%s2371_s3 + $0x50] sm:$0xff]  ;;  %v1550_v35 = vpack.c.bf16 %v50_v31, %v49_v29  ;;  %1574 = vmatpush1.bf16.msra.mxu1 %v1573_v30  ;;  %v52_v38 = vld [vmem:[%s2370_s2 + $0x58] sm:$0xff]  ;;  %v53_v40 = vld [vmem:[%s2370_s2 + $0x60] sm:$0xff]  ;;  %234 = vmatprep.mubr.f32.mxu1 %v1764_v59  ;;  %vm166_vm2 = vcmask 523264   ;;  %vm253_vm3 = vcmask 48128   ;;  %vm1765_vm4 = vmmov 0  }
   0xf   :  { %v1577_v36 = vpack.c.bf16 %v160_v34, %v158_v33  ;;  %v51_v37 = vld [vmem:[%s2370_s2 + $0x50] sm:$0xff]  ;;  %1576 = vmatprep.subr.bf16.mxu1 %v1575_v32  ;;  %v54_v41 = vld [vmem:[%s2370_s2 + $0x68] sm:$0xff]  ;;  %v56_v44 = vld [vmem:[%s2370_s2 + $0x78] sm:$0xff]  ;;  %s1766_s26 = smov 32   ;;  %s1767_s0 = smov 80   ;;  %vm359_vm5 = vcmask 654336  }
  0x10   :  { %1548 = vmatpush1.bf16.msra.mxu0 %v1547_v28  ;;  %v1553_v39 = vpack.c.bf16 %v52_v38, %v51_v37  ;;  %v1556_v42 = vpack.c.bf16 %v54_v41, %v53_v40  ;;  %v55_v43 = vld [vmem:[%s2370_s2 + $0x70] sm:$0xff]  ;;  %v57_v46 = vld [vmem:[%s2370_s2 + $0x80] sm:$0xff]  ;;  %v58_v47 = vld [vmem:[%s2370_s2 + $0x88] sm:$0xff]  ;;  %s1768_s13 = smov 112   ;;  %vm449_vm7 = vcmask 326656   ;;  %vm606_vm8 = vcmask 916480  }
  0x11   :  { %1549 = vmatprep.subr.bf16.mxu0 %v1762_v3  ;;  %v1559_v45 = vpack.c.bf16 %v56_v44, %v55_v43  ;;  %v1562_v48 = vpack.c.bf16 %v58_v47, %v57_v46  ;;  %v59_v49 = vld [vmem:[%s2370_s2 + $0x90] sm:$0xff]  ;;  %v60_v50 = vld [vmem:[%s2370_s2 + $0x98] sm:$0xff]  ;;  %v163_v52 = vld [vmem:[%s2371_s3 + $0x68] sm:$0xff]  ;;  %vm812_vm9 = vcmask 785408   ;;  %vm902_vm11 = vcmask 130048   ;;  %s1769_s27 = smov [#allocation2]  }
  0x12   :  { %1578 = vmatpush1.bf16.msra.mxu1 %v1577_v36  ;;  %v1565_v51 = vpack.c.bf16 %v60_v50, %v59_v49  ;;  %v165_v53 = vld [vmem:[%s2371_s3 + $0x78] sm:$0xff]  ;;  %v162_v55 = vld [vmem:[%s2371_s3 + $0x60] sm:$0xff]  ;;  %v164_v56 = vld [vmem:[%s2371_s3 + $0x70] sm:$0xff]  ;;  %s1280_s28 = sshll.u32 %s1769_s27, 4  ;;  %vm1272_vm13 = vcmask 33792   ;;  %s1281_s28 = int_to_ptr.vmem [resolvable:$true] %s1280_s28 }
  0x13   :  { %v1579_v54 = vpack.c.bf16 %v165_v53, %v163_v52  ;;  %v1581_v57 = vpack.c.bf16 %v164_v56, %v162_v55  ;;  %v242_v58 = vld [vmem:[%s2372_s4 + $0x8] sm:$0x3f]  ;;  %v1288_v60 = vld [vmem:[%s2369_s1] ss:$0 sm:$0xff]  ;;  %v346_v7 = vld [vmem:[%s2374_s6 + $0x10] sm:$0xff]  ;;  %s1738_s29 = scalar_lea.vmem %s1281_s28, 32  ;;  %p1743_p1 = scmp.lt.s32.totalorder %s1281_s28, %s1281_s28 }
  0x14   :  { %1551 = vmatpush1.bf16.msra.mxu0 %v1550_v35  ;;  %v241_v1 = vld [vmem:[%s2372_s4] sm:$0x3f]  ;;  %v345_v4 = vld [vmem:[%s2374_s6 + $0x8] sm:$0xff]  ;;  %v347_v8 = vld [vmem:[%s2374_s6 + $0x18] sm:$0xff]  ;;  %p1739_p0 = scmp.ne.s32.totalorder %s1281_s28, %s1738_s29  ;;  %p1744_p2 = scmp.lt.s32.totalorder %s1738_s29, %s1738_s29 }
  0x15   :  { %1552 = vmatprep.subr.bf16.mxu0 %v1762_v3  ;;  %1580 = vmatprep.subr.bf16.mxu1 %v1579_v54  ;;  %v344_v2 = vld [vmem:[%s2374_s6] sm:$0xff]  ;;  %v1587_v9 = vpack.c.bf16 %v347_v8, %v346_v7  ;;  %v350_v13 = vld [vmem:[%s2374_s6 + $0x30] sm:$0xff]  ;;  %v351_v14 = vld [vmem:[%s2374_s6 + $0x38] sm:$0xff] }
  0x16   :  { %1582 = vmatpush1.bf16.msra.mxu1 %v1581_v57  ;;  %v1584_v6 = vpack.c.bf16 %v345_v4, %v344_v2  ;;  %v348_v10 = vld [vmem:[%s2374_s6 + $0x20] sm:$0xff]  ;;  %v1593_v15 = vpack.c.bf16 %v351_v14, %v350_v13  ;;  %v353_v17 = vld [vmem:[%s2374_s6 + $0x48] sm:$0xff]  ;;  %v437_v40 = vld [vmem:[%s2375_s7 + $0x18] sm:$0xff]  ;;  %p1745_p3 = por %p1744_p2, %p1743_p1 }
  0x17   :  { %1293 = vmatprep.subr.msk.mxu1 %vm256_vm1, %v242_v58  ;;  %v352_v16 = vld [vmem:[%s2374_s6 + $0x40] sm:$0xff]  ;;  %v2018_v20 = vld [vmem:[%s2377_s9 + $0x8] sm:$0xff]  ;;  %v444_v43 = vld [vmem:[%s2375_s7 + $0x50] sm:$0xff] }
  0x18   :  { %1554 = vmatpush1.bf16.msra.mxu0 %v1553_v39  ;;  %v2013_v18 = vld [vmem:[%s2377_s9] sm:$0xff]  ;;  %v1596_v19 = vpack.c.bf16 %v353_v17, %v352_v16  ;;  %v2028_v22 = vld [vmem:[%s2377_s9 + $0x28] sm:$0xff]  ;;  %v617_v13 = vld [vmem:[%s2376_s8 + $0x30] sm:$0xff]  ;;  %p1746_p4 = pnand %p1745_p3, %p1739_p0 }
  0x19   :  { %1555 = vmatprep.subr.bf16.mxu0 %v1762_v3  ;;  %v2023_v21 = vld [vmem:[%s2377_s9 + $0x20] sm:$0xff]  ;;  %v1657_v23 = vpack.c.bf16 %v2018_v20, %v2013_v18  ;;  %v2044_v26 = vld [vmem:[%s2377_s9 + $0x48] sm:$0xff]  ;;  %v1706_v30 = vpack.i.bf16 %v2018_v20, %v2013_v18  ;;  %v618_v14 = vld [vmem:[%s2376_s8 + $0x38] sm:$0xff] }
  0x1a   :  { %v1663_v24 = vpack.c.bf16 %v2028_v22, %v2023_v21  ;;  %v2039_v25 = vld [vmem:[%s2377_s9 + $0x40] sm:$0xff]  ;;  %v435_v32 = vld [vmem:[%s2375_s7 + $0x8] sm:$0xff]  ;;  %v1716_v38 = vpack.i.bf16 %v2028_v22, %v2023_v21  ;;  %v1626_v17 = vpack.c.bf16 %v618_v14, %v617_v13  ;;  %v806_v18 = vld [vmem:[%s2377_s9 + $0x30] sm:$0xff] }
  0x1b   :  { %v1669_v27 = vpack.c.bf16 %v2044_v26, %v2039_v25  ;;  %v1296_v31 = vld [vmem:[%s2369_s1 + $0x1] ss:$0 sm:$0xff]  ;;  %v443_v49 = vld [vmem:[%s2375_s7 + $0x48] sm:$0xff]  ;;  %v807_v20 = vld [vmem:[%s2377_s9 + $0x38] sm:$0xff] }
  0x1c   :  { %1557 = vmatpush1.bf16.msra.mxu0 %v1556_v42  ;;  %v438_v33 = vld [vmem:[%s2375_s7 + $0x20] sm:$0xff]  ;;  %v441_v42 = vld [vmem:[%s2375_s7 + $0x38] sm:$0xff]  ;;  %v447_v52 = vld [vmem:[%s2375_s7 + $0x68] sm:$0xff] }
  0x1d   :  { %1558 = vmatprep.subr.bf16.mxu0 %v1762_v3  ;;  %v1598_v35 = vpack.c.bf16 %v438_v33, %v435_v32  ;;  %v434_v39 = vld [vmem:[%s2375_s7] sm:$0xff]  ;;  %v1602_v47 = vpack.c.bf16 %v444_v43, %v441_v42  ;;  %v628_v55 = vld [vmem:[%s2376_s8 + $0x88] sm:$0xff]  ;;  %v638_v32 = vld [vmem:[%s2376_s8 + $0xd8] sm:$0xff] }
  0x1e   :  { %v1600_v46 = vpack.c.bf16 %v437_v40, %v434_v39  ;;  %v446_v53 = vld [vmem:[%s2375_s7 + $0x60] sm:$0xff]  ;;  %v612_v58 = vld [vmem:[%s2376_s8 + $0x8] sm:$0xff]  ;;  %v810_v21 = vld [vmem:[%s2377_s9 + $0x50] sm:$0xff] }
  0x1f   :  { %v627_v54 = vld [vmem:[%s2376_s8 + $0x80] sm:$0xff]  ;;  %v632_v4 = vld [vmem:[%s2376_s8 + $0xa8] sm:$0xff]  ;;  %v811_v22 = vld [vmem:[%s2377_s9 + $0x58] sm:$0xff] }
  0x20   :  { %1560 = vmatpush1.bf16.msra.mxu0 %v1559_v45  ;;  %v1726_v45 = vpack.i.bf16 %v2044_v26, %v2039_v25  ;;  %v611_v56 = vld [vmem:[%s2376_s8] sm:$0xff]  ;;  %v1612_v57 = vpack.c.bf16 %v628_v55, %v627_v54  ;;  %v616_v8 = vld [vmem:[%s2376_s8 + $0x28] sm:$0xff]  ;;  %v445_v54 = vld [vmem:[%s2375_s7 + $0x58] sm:$0xff] }
  0x21   :  { %1561 = vmatprep.subr.bf16.mxu0 %v1762_v3  ;;  %v631_v2 = vld [vmem:[%s2376_s8 + $0xa0] sm:$0xff]  ;;  %v636_v16 = vld [vmem:[%s2376_s8 + $0xc8] sm:$0xff] }
  0x22   :  { %v615_v7 = vld [vmem:[%s2376_s8 + $0x20] sm:$0xff]  ;;  %v640_v39 = vld [vmem:[%s2376_s8 + $0xe8] sm:$0xff] }
  0x23   :  { %v623_v42 = vld [vmem:[%s2376_s8 + $0x60] sm:$0xff]  ;;  %v624_v43 = vld [vmem:[%s2376_s8 + $0x68] sm:$0xff] }
  0x24   :  { %1563 = vmatpush1.bf16.msra.mxu0 %v1562_v48  ;;  %v440_v48 = vld [vmem:[%s2375_s7 + $0x30] sm:$0xff]  ;;  %v1301_v25 = vld [vmem:[%s2369_s1 + $0x3] ss:$0 sm:$0xff] }
  0x25   :  { %1564 = vmatprep.subr.bf16.mxu0 %v1762_v3 }
  0x28   :  { %1566 = vmatpush1.bf16.msra.mxu0 %v1565_v51  ;;  %v1604_v51 = vpack.c.bf16 %v443_v49, %v440_v48 }
  0x29   :  { %1613 = vmatprep.subr.bf16.mxu0 %v1612_v57  ;;  %v644_v57 = vld [vmem:[%s2376_s8 + $0x108] sm:$0xff] }
  0x2b   :  { %144 = vmatmul.mubr.f32.vlgmr.msra.gmra.mrb[0].mxu0 %v1859_v11  ;;  %v349_v11 = vld [vmem:[%s2374_s6 + $0x28] sm:$0xff] }
  0x2c   :  { %v1590_v12 = vpack.c.bf16 %v349_v11, %v348_v10  ;;  %v634_v10 = vld [vmem:[%s2376_s8 + $0xb8] sm:$0xff]  ;;  %v1622_v11 = vpack.c.bf16 %v616_v8, %v615_v7  ;;  %v647_v7 = vld [vmem:[%s2376_s8 + $0x120] sm:$0xff]  ;;  %v648_v8 = vld [vmem:[%s2376_s8 + $0x128] sm:$0xff] }
  0x77   :  { %v252_v5 = vpop.permute.xlu0 %251 }
  0xfe   :  { %v145_v61 = vpop.f32.mrb[0].mxu0 }
  0xff   :  { %v146_v62 = vadd.f32 %v1288_v60, %v145_v61  ;;  %v147_v63 = vpop.f32.mrb[1].mxu0  ;;  %v629_v60 = vld [vmem:[%s2376_s8 + $0x90] sm:$0xff]  ;;  %v630_v61 = vld [vmem:[%s2376_s8 + $0x98] sm:$0xff] }
 0x100   :  { %v1616_v63 = vpack.c.bf16 %v630_v61, %v629_v60  ;;  %v641_v61 = vld [vmem:[%s2376_s8 + $0xf0] sm:$0xff] }
 0x101   :  { %v149_v0 = vmax.f32 %v146_v62, 0.0  ;;  %v1614_v62 = vpack.c.bf16 %v612_v58, %v611_v56  ;;  %v643_v56 = vld [vmem:[%s2376_s8 + $0x100] sm:$0xff]  ;;  %v448_v58 = vld [vmem:[%s2375_s7 + $0x70] sm:$0xff] }
 0x102   :  { %v1645_v60 = vpack.c.bf16 %v644_v57, %v643_v56  ;;  %v1731_v57 = vpack.i.bf16 %v811_v22, %v810_v21 }
 0x103   :  { %1291 = vmatmul.mubr.msk.f32.vlgmr.msra.gmra.mrb[0].mxu1 %vm166_vm2, %v149_v0  ;;  %v613_v0 = vld [vmem:[%s2376_s8 + $0x10] sm:$0xff]  ;;  %1615 = vmatpush3.bf16.msra.mxu0 %v1614_v62  ;;  %v642_v62 = vld [vmem:[%s2376_s8 + $0xf8] sm:$0xff] }
 0x104   :  { %1294 = vmatpush1.msk.msra.mxu1 %vm256_vm1, %v241_v1  ;;  %327 = vmatprep.mubr.f32.mxu1 %v1764_v59  ;;  %v614_v1 = vld [vmem:[%s2376_s8 + $0x18] sm:$0xff] }
 0x105   :  { %1583 = vmatprep.subr.bf16.mxu1 %v1762_v3  ;;  %1617 = vmatprep.subr.bf16.mxu0 %v1616_v63  ;;  %v645_v63 = vld [vmem:[%s2376_s8 + $0x110] sm:$0xff] }
 0x107   :  { %1295 = vmatmul.mubr.msk.f32.vlgmr.msra.gmra.mrb[2].mxu1 %vm253_vm3, %v252_v5  ;;  %v1618_v5 = vpack.c.bf16 %v614_v1, %v613_v0  ;;  %v1640_v0 = vpack.c.bf16 %v642_v62, %v641_v61  ;;  %v646_v1 = vld [vmem:[%s2376_s8 + $0x118] sm:$0xff]  ;;  %v1305_v62 = vld [vmem:[%s2369_s1 + $0x5] ss:$0 sm:$0xff] }
 0x108   :  { %1585 = vmatpush3.bf16.msra.mxu1 %v1584_v6  ;;  %1429 = vmatprep.mubr.msk.f32.mxu1 %vm1765_vm4, %v1764_v59  ;;  %v1620_v6 = vpack.c.bf16 %v632_v4, %v631_v2  ;;  %v625_v2 = vld [vmem:[%s2376_s8 + $0x70] sm:$0xff]  ;;  %v626_v4 = vld [vmem:[%s2376_s8 + $0x78] sm:$0xff] }
 0x109   :  { %1586 = vmatprep.subr.bf16.mxu1 %v1762_v3  ;;  %1619 = vmatpush3.bf16.msra.mxu0 %v1618_v5  ;;  %v1648_v5 = vpack.c.bf16 %v646_v1, %v645_v63 }
 0x10a   :  { %1621 = vmatprep.subr.bf16.mxu0 %v1620_v6  ;;  %v1642_v6 = vpack.c.bf16 %v626_v4, %v625_v2 }
 0x10c   :  { %1588 = vmatpush3.bf16.msra.mxu1 %v1587_v9  ;;  %v633_v9 = vld [vmem:[%s2376_s8 + $0xb0] sm:$0xff] }
 0x10d   :  { %1589 = vmatprep.subr.bf16.mxu1 %v1762_v3  ;;  %1623 = vmatpush3.bf16.msra.mxu0 %v1622_v11  ;;  %v650_v11 = vld [vmem:[%s2376_s8 + $0x138] sm:$0xff] }
 0x110   :  { %1591 = vmatpush3.bf16.msra.mxu1 %v1590_v12  ;;  %v1624_v12 = vpack.c.bf16 %v634_v10, %v633_v9  ;;  %v1651_v9 = vpack.c.bf16 %v648_v8, %v647_v7  ;;  %v649_v10 = vld [vmem:[%s2376_s8 + $0x130] sm:$0xff] }
 0x111   :  { %1592 = vmatprep.subr.bf16.mxu1 %v1762_v3 }
 0x112   :  { %1625 = vmatprep.subr.bf16.mxu0 %v1624_v12  ;;  %v1654_v12 = vpack.c.bf16 %v650_v11, %v649_v10 }
 0x113   :  { %1627 = vmatpush3.bf16.msra.mxu0 %v1626_v17 }
 0x114   :  { %1594 = vmatpush3.bf16.msra.mxu1 %v1593_v15  ;;  %v635_v15 = vld [vmem:[%s2376_s8 + $0xc0] sm:$0xff] }
 0x115   :  { %1595 = vmatprep.subr.bf16.mxu1 %v1762_v3 }
 0x118   :  { %1597 = vmatpush3.bf16.msra.mxu1 %v1596_v19  ;;  %v1628_v19 = vpack.c.bf16 %v636_v16, %v635_v15 }
 0x119   :  { %1599 = vmatprep.subr.bf16.mxu1 %v1598_v35  ;;  %v621_v35 = vld [vmem:[%s2376_s8 + $0x50] sm:$0xff] }
 0x11a   :  { %1629 = vmatprep.subr.bf16.mxu0 %v1628_v19 }
 0x1d6   :  { %v2048_v28 = vpop.f32.mrb[0].mxu1 }
 0x1d7   :  { %598 = vrot.lane.b32.xlu1 %v2048_v28, %s1766_s26  ;;  %595 = vrot.lane.b32.xlu0 %v2048_v28, %s1767_s0  ;;  %v238_v29 = vpop.f32.mrb[1].mxu1 }
 0x1da   :  { %v329_v34 = vpop.f32.mrb[2].mxu1 }
 0x1db   :  { %v339_v36 = vadd.f32 %v1296_v31, %v329_v34  ;;  %601 = vrot.lane.b32.xlu1 %v2048_v28, %s1768_s13  ;;  %1707 = vrot.lane.b32.xlu0 %v1706_v30, %s1768_s13  ;;  %v2066_v37 = vpop.f32.mrb[3].mxu1  ;;  %v620_v30 = vld [vmem:[%s2376_s8 + $0x48] sm:$0xff]  ;;  %v637_v31 = vld [vmem:[%s2376_s8 + $0xd0] sm:$0xff] }
 0x1dc   :  { %v1632_v34 = vpack.c.bf16 %v638_v32, %v637_v31 }
 0x1dd   :  { %v340_v41 = vadd.f32 %v339_v36, %v238_v29  ;;  %v619_v29 = vld [vmem:[%s2376_s8 + $0x40] sm:$0xff]  ;;  %v622_v36 = vld [vmem:[%s2376_s8 + $0x58] sm:$0xff] }
 0x1de   :  { %v1630_v33 = vpack.c.bf16 %v620_v30, %v619_v29  ;;  %v1634_v40 = vpack.c.bf16 %v622_v36, %v621_v35  ;;  %v802_v36 = vld [vmem:[%s2377_s9 + $0x10] sm:$0xff] }
 0x1df   :  { %vm341_vm6 = vcmp.gt.f32.partialorder %v340_v41, 0.0  ;;  %v342_v44 = vmul.f32 0.02, %v340_v41  ;;  %1717 = vrot.lane.b32.xlu0 %v1716_v38, %s1768_s13  ;;  %v639_v38 = vld [vmem:[%s2376_s8 + $0xe0] sm:$0xff] }
 0x1e0   :  { %1631 = vmatpush3.bf16.msra.mxu0 %v1630_v33 }
 0x1e1   :  { %v343_v50 = vsel %vm341_vm6, %v340_v41, %v342_v44  ;;  %1633 = vmatprep.subr.bf16.mxu0 %v1632_v34  ;;  %v1636_v41 = vpack.c.bf16 %v640_v39, %v639_v38  ;;  %v1638_v44 = vpack.c.bf16 %v624_v43, %v623_v42 }
 0x1e2   :  { %1430 = vmatmul.mubr.msk.f32.vlgmr.msra.gmra.mrb[4].mxu1 %vm359_vm5, %v343_v50 }
 0x1e3   :  { %1727 = vrot.lane.b32.xlu0 %v1726_v45, %s1768_s13  ;;  %1601 = vmatpush1.bf16.msra.mxu1 %v1600_v46  ;;  %v1297_v45 = vld [vmem:[%s2369_s1 + $0x2] ss:$0 sm:$0xff]  ;;  %v436_v46 = vld [vmem:[%s2375_s7 + $0x10] sm:$0xff] }
 0x1e4   :  { %1603 = vmatprep.subr.bf16.mxu1 %v1602_v47  ;;  %517 = vmatprep.mubr.f32.mxu1 %v1764_v59  ;;  %v439_v47 = vld [vmem:[%s2375_s7 + $0x28] sm:$0xff] }
 0x1e5   :  { %1635 = vmatpush3.bf16.msra.mxu0 %v1634_v40 }
 0x1e6   :  { %1637 = vmatprep.subr.bf16.mxu0 %v1636_v41 }
 0x1e7   :  { %1104 = vrot.lane.b32.xlu0 %v2066_v37, %s1768_s13  ;;  %1605 = vmatpush1.bf16.msra.mxu1 %v1604_v51  ;;  %v1607_v51 = vpack.c.bf16 %v439_v47, %v436_v46  ;;  %v896_v46 = vld [vmem:[%s2378_s10 + $0x10] sm:$0xff] }
 0x1e8   :  { %461 = vmatprep.subr.mxu1 %v447_v52 }
 0x1e9   :  { %1639 = vmatpush3.bf16.msra.mxu0 %v1638_v44 }
 0x1ea   :  { %1641 = vmatprep.subr.bf16.mxu0 %v1640_v0 }
 0x1eb   :  { %462 = vmatpush1.msra.mxu1 %v446_v53  ;;  %v442_v53 = vld [vmem:[%s2375_s7 + $0x40] sm:$0xff] }
 0x1ec   :  { %1606 = vmatprep.subr.bf16.mxu1 %v1762_v3  ;;  %v1610_v55 = vpack.c.bf16 %v445_v54, %v442_v53 }
 0x1ed   :  { %1643 = vmatpush3.bf16.msra.mxu0 %v1642_v6 }
 0x1ee   :  { %1674 = vmatprep.subr.bf16.mxu0 %v1762_v3 }
 0x249   :  { %v599_v13 = vpop.permute.xlu1 %598  ;;  %v596_v14 = vpop.permute.xlu0 %595 }
 0x24a   :  { %v605_v16 = vsel %vm76_vm0, %v596_v14, %v599_v13  ;;  %v604_v19 = vsel %vm359_vm5, %v2048_v28, %v596_v14  ;;  %v803_v28 = vld [vmem:[%s2377_s9 + $0x18] sm:$0xff] }
 0x24b   :  { %v1660_v38 = vpack.c.bf16 %v803_v28, %v802_v36  ;;  %v1711_v56 = vpack.i.bf16 %v803_v28, %v802_v36  ;;  %v1192_v28 = vld [vmem:[%s2378_s10 + $0x8] sm:$0xff] }
 0x24d   :  { %v602_v15 = vpop.permute.xlu1 %601  ;;  %1712 = vrot.lane.b32.xlu1 %v1711_v56, %s1768_s13 }
 0x24e   :  { %v607_v31 = vsel %vm606_vm8, %v605_v16, %v602_v15 }
 0x2b5   :  { %v429_v48 = vpop.f32.mrb[4].mxu1 }
 0x2b6   :  { %v430_v49 = vadd.f32 %v1297_v45, %v429_v48  ;;  %v1431_v50 = vpop.f32.mrb[5].mxu1  ;;  %v895_v45 = vld [vmem:[%s2378_s10] sm:$0xff] }
 0x2b7   :  { %v1675_v47 = vpack.c.bf16 %v896_v46, %v895_v45 }
 0x2b8   :  { %v433_v52 = vmax.f32 %v430_v49, 0.0  ;;  %v1304_v49 = vld [vmem:[%s2369_s1 + $0x4] ss:$0 sm:$0xff] }
 0x2ba   :  { %1299 = vmatmul.mubr.msk.f32.vlgmr.msra.gmra.mrb[6].mxu1 %vm449_vm7, %v433_v52 }
 0x2bb   :  { %1608 = vmatpush3.bf16.msra.mxu1 %v1607_v51  ;;  %1442 = vmatprep.mubr.msk.f32.mxu1 %vm1765_vm4, %v1764_v59 }
 0x2bc   :  { %1609 = vmatprep.subr.bf16.mxu1 %v1762_v3 }
 0x2bf   :  { %1611 = vmatpush3.bf16.msra.mxu1 %v1610_v55  ;;  %v977_v55 = vld [vmem:[%s2373_s5] sm:$0x3f]  ;;  %v1713_v63 = vpop.permute.xlu1 %1712 }
 0x2c0   :  { %1440 = vmatprep.subr.mxu1 %v1764_v59  ;;  %v1714_v6 = vunpack.i.l.bf16 %v1713_v63 }
 0x2c3   :  { %1441 = vmatpush3.msra.mxu1 %v448_v58  ;;  %v1708_v58 = vpop.permute.xlu0 %1707 }
 0x2c4   :  { %1443 = vmatmul.mubr.msk.f32.vlgmr.msra.gmra.mrb[8].mxu1 %vm449_vm7, %v433_v52  ;;  %1644 = vmatprep.subr.bf16.mxu1 %v1762_v3  ;;  %v1709_v61 = vunpack.i.l.bf16 %v1708_v58 }
 0x2c5   :  { %1646 = vmatpush3.bf16.msra.mxu1 %v1645_v60  ;;  %1461 = vmatprep.mubr.msk.f32.mxu1 %vm1765_vm4, %v1764_v59  ;;  %v1710_v60 = vunpack.i.h.bf16 %v1708_v58 }
 0x2c6   :  { %1647 = vmatprep.subr.bf16.mxu1 %v1762_v3 }
 0x2c7   :  { %v1678_v4 = vpack.c.bf16 %v1710_v60, %v1709_v61  ;;  %v1718_v8 = vpop.permute.xlu0 %1717 }
 0x2c8   :  { %v1719_v10 = vunpack.i.l.bf16 %v1718_v8 }
 0x2c9   :  { %1649 = vmatpush3.bf16.msra.mxu1 %v1648_v5  ;;  %v1715_v5 = vunpack.i.h.bf16 %v1713_v63 }
 0x2ca   :  { %1650 = vmatprep.subr.bf16.mxu1 %v1762_v3 }
 0x2cb   :  { %v1681_v11 = vpack.c.bf16 %v1715_v5, %v1714_v6  ;;  %v1728_v16 = vpop.permute.xlu0 %1727 }
 0x2cd   :  { %1652 = vmatpush3.bf16.msra.mxu1 %v1651_v9  ;;  %v1720_v9 = vunpack.i.h.bf16 %v1718_v8 }
 0x2ce   :  { %1653 = vmatprep.subr.bf16.mxu1 %v1762_v3 }
 0x2cf   :  { %v1684_v13 = vpack.c.bf16 %v1720_v9, %v1719_v10 }
 0x2d1   :  { %1655 = vmatpush3.bf16.msra.mxu1 %v1654_v12 }
 0x2d2   :  { %1656 = vmatprep.subr.bf16.mxu1 %v1762_v3 }
 0x38d   :  { %v519_v17 = vpop.f32.mrb[6].mxu1 }
 0x38e   :  { %v608_v29 = vmul.f32 %v604_v19, %v519_v17  ;;  %v521_v30 = vpop.f32.mrb[7].mxu1  ;;  %v1730_v17 = vunpack.i.h.bf16 %v1728_v16  ;;  %v1729_v19 = vunpack.i.l.bf16 %v1728_v16 }
 0x38f   :  { %v609_v32 = vmul.f32 %v607_v31, %v521_v30 }
 0x390   :  { %v1690_v31 = vpack.c.bf16 %v1730_v17, %v1729_v19 }
 0x391   :  { %723 = vmatprep.mubr.f32.mxu0 %v609_v32 }
 0x392   :  { %724 = vmatmul.mubr.f32.vlgmr.msra.gmra.mrb[2].mxu0 %v608_v29 }
 0x393   :  { %1495 = vmatprep.mubr.msk.f32.mxu0 %vm1765_vm4, %v1764_v59  ;;  %1676 = vmatpush3.bf16.msra.mxu0 %v1675_v47 }
 0x394   :  { %1498 = vmatprep.subr.mxu0 %v1764_v59 }
 0x397   :  { %v590_v33 = vpop.f32.mrb[8].mxu1 }
 0x398   :  { %v610_v34 = vmul.f32 %v602_v15, %v590_v33  ;;  %v1444_v35 = vpop.f32.mrb[9].mxu1 }
 0x39a   :  { %1462 = vmatmul.mubr.msk.f32.vlgmr.msra.gmra.mrb[10].mxu1 %vm166_vm2, %v610_v34 }
 0x39b   :  { %1658 = vmatpush3.bf16.msra.mxu1 %v1657_v23  ;;  %1488 = vmatprep.mubr.msk.f32.mxu1 %vm1765_vm4, %v1764_v59  ;;  %v1666_v23 = vpack.c.bf16 %v807_v20, %v806_v18 }
 0x39c   :  { %1659 = vmatprep.subr.bf16.mxu1 %v1762_v3 }
 0x39f   :  { %1661 = vmatpush3.bf16.msra.mxu1 %v1660_v38  ;;  %v1193_v38 = vld [vmem:[%s2378_s10 + $0x18] sm:$0xff] }
 0x3a0   :  { %1662 = vmatprep.subr.bf16.mxu1 %v1762_v3 }
 0x3a3   :  { %1664 = vmatpush3.bf16.msra.mxu1 %v1663_v24  ;;  %v1672_v24 = vpack.c.bf16 %v811_v22, %v810_v21 }
 0x3a4   :  { %1665 = vmatprep.subr.bf16.mxu1 %v1762_v3 }
 0x3a7   :  { %1667 = vmatpush3.bf16.msra.mxu1 %v1666_v23  ;;  %v1310_v23 = vld [vmem:[%s2369_s1 + $0x6] ss:$0 sm:$0xff] }
 0x3a8   :  { %1668 = vmatprep.subr.bf16.mxu1 %v1762_v3 }
 0x3ab   :  { %1670 = vmatpush3.bf16.msra.mxu1 %v1669_v27 }
 0x3ac   :  { %1671 = vmatprep.subr.bf16.mxu1 %v1762_v3 }
 0x3af   :  { %1673 = vmatpush3.bf16.msra.mxu1 %v1672_v24 }
 0x3b0   :  { %1695 = vmatprep.subr.bf16.mxu1 %v1762_v3 }
 0x465   :  { %v1363_v39 = vpop.f32.mrb[2].mxu0 }
 0x466   :  { %v1364_v40 = vpop.f32.mrb[3].mxu0 }
 0x467   :  { %v1365_v41 = vadd.f32 %v1364_v40, %v1363_v39 }
 0x469   :  { %v726_v26 = vadd.f32 %v1365_v41, %v1301_v25 }
 0x46d   :  { %v795_v27 = vpop.f32.mrb[10].mxu1 }
 0x46e   :  { %v2299_v42 = vadd.f32 %v795_v27, %v726_v26  ;;  %v1463_v43 = vpop.f32.mrb[11].mxu1  ;;  %v1312_v27 = vld [vmem:[%s2369_s1 + $0x7] ss:$0 sm:$0xff] }
 0x470   :  { %v799_v44 = vmax.f32 %v2299_v42, 0.0 }
 0x472   :  { %1489 = vmatmul.mubr.msk.f32.vlgmr.msra.gmra.mrb[12].mxu1 %vm812_vm9, %v799_v44 }
 0x473   :  { %1534 = vmatprep.mubr.msk.f32.mxu1 %vm1765_vm4, %v1764_v59 }
 0x545   :  { %v882_v48 = vpop.f32.mrb[12].mxu1 }
 0x546   :  { %v883_v50 = vadd.f32 %v882_v48, %v2066_v37  ;;  %v1490_v51 = vpop.f32.mrb[13].mxu1  ;;  %v1721_v37 = vpack.i.bf16 %v807_v20, %v806_v18  ;;  %v1696_v18 = vpack.c.bf16 %v1193_v38, %v1192_v28  ;;  %v1105_v20 = vpop.permute.xlu0 %1104 }
 0x548   :  { %v891_v52 = vadd.f32 %v1304_v49, %v883_v50  ;;  %1722 = vrot.lane.b32.xlu1 %v1721_v37, %s1768_s13  ;;  %1697 = vmatpush3.bf16.msra.mxu1 %v1696_v18 }
 0x54a   :  { %vm892_vm10 = vcmp.gt.f32.partialorder %v891_v52, 0.0  ;;  %v893_v53 = vmul.f32 0.01, %v891_v52 }
 0x54c   :  { %v894_v54 = vsel %vm892_vm10, %v891_v52, %v893_v53  ;;  %1732 = vrot.lane.b32.xlu1 %v1731_v57, %s1768_s13 }
 0x54d   :  { %1496 = vmatmul.mubr.msk.f32.vlgmr.msra.gmra.mrb[4].mxu0 %vm902_vm11, %v894_v54 }
 0x54e   :  { %1500 = vmatprep.mubr.msk.f32.mxu0 %vm1765_vm4, %v1764_v59  ;;  %1499 = vmatpush3.msk.msra.mxu0 %vm256_vm1, %v977_v55 }
 0x54f   :  { %1677 = vmatprep.subr.bf16.mxu0 %v1762_v3 }
 0x5ba   :  { %v1723_v12 = vpop.permute.xlu1 %1722 }
 0x5bb   :  { %v1725_v14 = vunpack.i.h.bf16 %v1723_v12  ;;  %v1724_v15 = vunpack.i.l.bf16 %v1723_v12 }
 0x5bd   :  { %v1687_v29 = vpack.c.bf16 %v1725_v14, %v1724_v15 }
 0x5be   :  { %v1733_v30 = vpop.permute.xlu1 %1732 }
 0x5bf   :  { %v1734_v32 = vunpack.i.l.bf16 %v1733_v30 }
 0x620   :  { %v972_v0 = vpop.f32.mrb[4].mxu0 }
 0x621   :  { %v973_v1 = vadd.f32 %v1305_v62, %v972_v0  ;;  %v1497_v2 = vpop.f32.mrb[5].mxu0 }
 0x623   :  { %v976_v7 = vmax.f32 %v973_v1, 0.0 }
 0x625   :  { %1501 = vmatmul.mubr.msk.f32.vlgmr.msra.gmra.mrb[6].mxu0 %vm253_vm3, %v976_v7 }
 0x626   :  { %1679 = vmatpush3.bf16.msra.mxu0 %v1678_v4  ;;  %1527 = vmatprep.mubr.msk.f32.mxu0 %vm1765_vm4, %v1764_v59  ;;  %v1735_v59 = vunpack.i.h.bf16 %v1733_v30 }
 0x627   :  { %1680 = vmatprep.subr.bf16.mxu0 %v1762_v3 }
 0x628   :  { %v1693_v33 = vpack.c.bf16 %v1735_v59, %v1734_v32 }
 0x62a   :  { %1682 = vmatpush3.bf16.msra.mxu0 %v1681_v11 }
 0x62b   :  { %1683 = vmatprep.subr.bf16.mxu0 %v1762_v3 }
 0x62e   :  { %1685 = vmatpush3.bf16.msra.mxu0 %v1684_v13 }
 0x62f   :  { %1686 = vmatprep.subr.bf16.mxu0 %v1762_v3 }
 0x632   :  { %1688 = vmatpush3.bf16.msra.mxu0 %v1687_v29 }
 0x633   :  { %1689 = vmatprep.subr.bf16.mxu0 %v1762_v3 }
 0x636   :  { %1691 = vmatpush3.bf16.msra.mxu0 %v1690_v31 }
 0x637   :  { %1692 = vmatprep.subr.bf16.mxu0 %v1762_v3 }
 0x63a   :  { %1694 = vmatpush3.bf16.msra.mxu0 %v1693_v33 }
 0x6f8   :  { %v1050_v34 = vpop.f32.mrb[6].mxu0 }
 0x6f9   :  { %v1054_v35 = vmul.f32 %v1050_v34, %v799_v44  ;;  %v1502_v36 = vpop.f32.mrb[7].mxu0 }
 0x6fb   :  { %1528 = vmatmul.mubr.msk.f32.vlgmr.msra.gmra.mrb[8].mxu0 %vm812_vm9, %v1054_v35 }
 0x7ce   :  { %v1176_v3 = vpop.f32.mrb[8].mxu0 }
 0x7cf   :  { %v1177_v21 = vadd.f32 %v1176_v3, %v1105_v20  ;;  %v1529_v22 = vpop.f32.mrb[9].mxu0 }
 0x7d1   :  { %v1185_v24 = vadd.f32 %v1310_v23, %v1177_v21 }
 0x7d3   :  { %v1187_v39 = vmin.f32 %v1185_v24, 0.0  ;;  %vm1186_vm12 = vcmp.gt.f32.partialorder %v1185_v24, 0.0 }
 0x7d5   :  { %v1188_v40 = vmul.f32 1.442695, %v1187_v39 }
 0x7d7   :  { %1736 = vpow2.f32 %v1188_v40 }
 0x7e1   :  { %v1737_v41 = vpop.eup %1736 }
 0x7e2   :  { %v1311_v25 = vadd.f32 -1.0, %v1737_v41 }
 0x7e4   :  { %v1191_v26 = vsel %vm1186_vm12, %v1185_v24, %v1311_v25 }
 0x7e5   :  { %1535 = vmatmul.mubr.msk.f32.vlgmr.msra.gmra.mrb[14].mxu1 %vm902_vm11, %v1191_v26 }
 0x8b8   :  { %v1268_v42 = vpop.f32.mrb[14].mxu1 }
 0x8b9   :  { %v1269_v43 = vadd.f32 %v1312_v27, %v1268_v42  ;;  %v1536_v44 = vpop.f32.mrb[15].mxu1 }
 0x8bb   :  { %1273 = vst.msk [vmem:[#allocation2] sm:$0x3] %vm1272_vm13, %v1269_v43 }
 0x8bc   :  { %1749 = shalt.err (!%p1746_p4)
}
 0x8bd   :  { %s1750_s2 = scalar_lea.hbm %s2379_s11, 32 }
 0x8be   :  { %p1751_p5 = scmp.ne.s32.totalorder %s2379_s11, %s1750_s2  ;;  %p1754_p6 = scmp.lt.u32.totalorder %s1750_s2, %s2379_s11 }
 0x8c0   :  { %p1756_p7 = pnand %p1754_p6, %p1751_p5 }
 0x8c2   :  { %1759 = shalt.err (!%p1756_p7)
}
 0x8c3   :  { %1283 = dma.vmem_to_hbm [thread:$0]  %s1281_s28, 32, %s2379_s11, [#allocation3]  }
 0x8c4   :  { %1760 = dma.done.wait [#allocation3], 32  }
 0x8c5   :  { %1761 = vsyncadd [#allocation3], 4294967264 }
 0x8c6   :  { %1287 = vsyncpa [#allocation3], 1 }

</bundles_post_ra>
